<compile_context>
chip_gen: v7x
topology: tpu7x:2x2x1
jax: 0.10.0
libtpu: 0.0.40
codegen_flags: <defaults>
</compile_context>

<pallas_src>
import functools

import jax
import jax.numpy as jnp
from jax.experimental import pallas as pl
from jax.experimental.pallas import tpu as pltpu

KERNEL_SIZE = 11
SIGMA = 1.5
K1 = 0.01
K2 = 0.03
PAD = (KERNEL_SIZE - 1) // 2


def _gaussian_1d(kernel_size: int, sigma: float) -> jnp.ndarray:
    dist = jnp.arange(
        (1 - kernel_size) / 2.0, (1 + kernel_size) / 2.0, 1.0, dtype=jnp.float32
    )
    g = jnp.exp(-jnp.square(dist / sigma) / 2.0)
    return g / jnp.sum(g)


def _folded_band_matrix(n: int, g: jnp.ndarray) -> jnp.ndarray:
    """(n_out, n) matrix = reflect-pad -> 'valid' gaussian blur -> crop PAD/side."""
    k = g.shape[0]
    npad = n + 2 * PAD
    # Valid-conv band matrix over the padded axis: band[o, p] = g[p - o].
    off = jnp.arange(npad)[None, :] - jnp.arange(n)[:, None]          # (n, npad)
    band = jnp.where((off >= 0) & (off < k), g[jnp.clip(off, 0, k - 1)], 0.0)
    band = band.astype(jnp.float32)
    # Reflect-pad selector (npad, n): padded index p reads original reflect(p-PAD).
    src = jnp.arange(npad) - PAD
    src = jnp.where(src < 0, -src, src)
    src = jnp.where(src > n - 1, 2 * (n - 1) - src, src)
    refl = (src[:, None] == jnp.arange(n)[None, :]).astype(jnp.float32)  # (npad, n)
    folded = band @ refl                                               # (n, n)
    return folded[PAD:n - PAD, :]                                      # (n_out, n)


def _pick_block_b(n_imgs: int, hw: int) -> int:
    """Images per grid step, sized for ~24 MiB VMEM working set (v7x-safe)."""
    budget = 24 * 1024 * 1024
    # ~12 f32 copies of each image row live per block (2 inputs double-buffered,
    # 5 stacked stats, blurred maps, headroom).
    b = budget // max(1, hw * 4 * 12)
    b = int(max(8, min(b, 1024)))
    b = (b // 8) * 8
    if n_imgs <= b:
        return n_imgs           # single full-extent block (always a legal block)
    return b                    # multiple of 8; last block masked in-kernel


def _make_ssim_kernel(n_imgs: int, block_b: int):
    needs_mask = (n_imgs % block_b) != 0

    def kernel(c_ref, kt_ref, x_ref, y_ref, out_ref):
        c1 = c_ref[0]
        c2 = c_ref[1]

        if needs_mask:
            ids = (
                jax.lax.broadcasted_iota(jnp.int32, (block_b, 1), 0)
                + pl.program_id(0) * block_b
            )
            valid = ids < n_imgs                     # (B, 1)
            # jnp.where (not multiply) so OOB garbage (possibly NaN/Inf) is dropped.
            x = jnp.where(valid, x_ref[...], 0.0)
            y = jnp.where(valid, y_ref[...], 0.0)
        else:
            x = x_ref[...]                           # (B, H*W), lane-dense
            y = y_ref[...]

        # Fuse all five statistics of all B images into one MXU matmul:
        # (5B, H*W) @ (H*W, Ho*Wo). Kt already contains reflect-pad + blur + crop.
        stats = jnp.concatenate([x, y, x * x, y * y, x * y], axis=0)
        blurred = jnp.dot(stats, kt_ref[...], preferred_element_type=jnp.float32)

        b = block_b
        mu_x = blurred[0 * b:1 * b]
        mu_y = blurred[1 * b:2 * b]
        e_xx = blurred[2 * b:3 * b]
        e_yy = blurred[3 * b:4 * b]
        e_xy = blurred[4 * b:5 * b]

        mu_x2 = mu_x * mu_x
        mu_y2 = mu_y * mu_y
        mu_xy = mu_x * mu_y
        sig_x = e_xx - mu_x2
        sig_y = e_yy - mu_y2
        sig_xy = e_xy - mu_xy

        num = (2.0 * mu_xy + c1) * (2.0 * sig_xy + c2)
        den = (mu_x2 + mu_y2 + c1) * (sig_x + sig_y + c2)
        ssim_map = num * pl.reciprocal(den, approx=True)   # EUP, VALU stays free

        if needs_mask:
            ssim_map = jnp.where(valid, ssim_map, 0.0)
        partial = jnp.sum(ssim_map)

        # Lane-dense per-block partial sum (scalar in [0,0,0], zeros elsewhere);
        # the tiny final reduction + "1 - mean" happens in XLA.
        row = jax.lax.broadcasted_iota(jnp.int32, (1, 8, 128), 1)
        lane = jax.lax.broadcasted_iota(jnp.int32, (1, 8, 128), 2)
        out_ref[...] = jnp.where((row == 0) & (lane == 0), partial, 0.0)

    return kernel


@functools.partial(jax.jit, static_argnames=("data_range",))
def reconstruction_loss(y_pred: jnp.ndarray, y_true: jnp.ndarray,
                        data_range=None) -> jnp.ndarray:
    """1 - SSIM(y_pred, y_true), inputs NCHW. Optional static data_range skips
    the global min/max pass (torchmetrics default computes it from the data)."""
    n, c, h, w = y_pred.shape
    n_imgs = n * c
    ho, wo = h - 2 * PAD, w - 2 * PAD
    hw, howo = h * w, ho * wo

    y_pred = y_pred.astype(jnp.float32)
    y_true = y_true.astype(jnp.float32)

    if data_range is None:
        dr = jnp.maximum(
            jnp.max(y_pred) - jnp.min(y_pred), jnp.max(y_true) - jnp.min(y_true)
        )
    else:
        dr = jnp.float32(data_range)
    c1 = jnp.square(K1 * dr)
    c2 = jnp.square(K2 * dr)
    consts = jnp.stack([c1, c2]).astype(jnp.float32)       # (2,) -> SMEM

    # Reflect-pad + separable gaussian blur + crop, folded into one matrix.
    g = _gaussian_1d(KERNEL_SIZE, SIGMA)
    bh = _folded_band_matrix(h, g)                          # (ho, h)
    bw = _folded_band_matrix(w, g)                          # (wo, w)
    kt = jnp.kron(bh, bw).T.astype(jnp.float32)             # (h*w, ho*wo)

    # Free reshape (row-major): no padding / transpose copies in HBM.
    xr = y_pred.reshape(n_imgs, hw)
    yr = y_true.reshape(n_imgs, hw)

    block_b = _pick_block_b(n_imgs, hw)
    n_blocks = -(-n_imgs // block_b)
    crop_count = n_imgs * ho * wo

    kernel = _make_ssim_kernel(n_imgs, block_b)

    partials = pl.pallas_call(
        kernel,
        out_shape=jax.ShapeDtypeStruct((n_blocks, 8, 128), jnp.float32),
        grid=(n_blocks,),
        in_specs=[
            pl.BlockSpec(memory_space=pltpu.MemorySpace.SMEM),   # c1, c2
            pl.BlockSpec((hw, howo), lambda i: (0, 0)),          # fused blur matrix
            pl.BlockSpec((block_b, hw), lambda i: (i, 0)),       # pred rows
            pl.BlockSpec((block_b, hw), lambda i: (i, 0)),       # true rows
        ],
        out_specs=pl.BlockSpec((1, 8, 128), lambda i: (i, 0, 0)),
        compiler_params=pltpu.CompilerParams(
            dimension_semantics=("parallel",),                   # v7x: both TCs
            vmem_limit_bytes=48 * 1024 * 1024,
        ),
    )(consts, kt, xr, yr)

    total = jnp.sum(partials)
    return 1.0 - total / jnp.float32(crop_count)


def _reconstruction_loss_ref(y_pred, y_true):
    """Pure-JAX reference (depthwise conv) mirroring torchmetrics SSIM."""
    n, c, h, w = y_pred.shape
    y_pred = y_pred.astype(jnp.float32)
    y_true = y_true.astype(jnp.float32)
    dr = jnp.maximum(
        jnp.max(y_pred) - jnp.min(y_pred), jnp.max(y_true) - jnp.min(y_true)
    )
    c1 = jnp.square(K1 * dr)
    c2 = jnp.square(K2 * dr)
    g = _gaussian_1d(KERNEL_SIZE, SIGMA)
    g2d = jnp.outer(g, g)
    kern = jnp.broadcast_to(g2d, (c, 1, KERNEL_SIZE, KERNEL_SIZE))

    pad_cfg = ((0, 0), (0, 0), (PAD, PAD), (PAD, PAD))
    pp = jnp.pad(y_pred, pad_cfg, mode="reflect")
    tp = jnp.pad(y_true, pad_cfg, mode="reflect")

    def blur(z):
        return jax.lax.conv_general_dilated(
            z, kern, window_strides=(1, 1), padding="VALID",
            dimension_numbers=("NCHW", "OIHW", "NCHW"), feature_group_count=c,
        )

    mu_x, mu_y = blur(pp), blur(tp)
    e_xx, e_yy, e_xy = blur(pp * pp), blur(tp * tp), blur(pp * tp)
    mu_x2, mu_y2, mu_xy = mu_x * mu_x, mu_y * mu_y, mu_x * mu_y
    ssim_map = ((2 * mu_xy + c1) * (2 * (e_xy - mu_xy) + c2)) / (
        (mu_x2 + mu_y2 + c1) * ((e_xx - mu_x2) + (e_yy - mu_y2) + c2)
    )
    crop = ssim_map[..., PAD : h - PAD, PAD : w - PAD]
    return 1.0 - jnp.mean(crop)


if __name__ == "__main__":
    key = jax.random.PRNGKey(0)
    k1, k2 = jax.random.split(key)
    # Small NCHW inputs consistent with an image reconstruction task.
    y_pred = jax.random.uniform(k1, (2, 4, 16, 16), dtype=jnp.float32)
    y_true = jax.random.uniform(k2, (2, 4, 16, 16), dtype=jnp.float32)

    loss = reconstruction_loss(y_pred, y_true)
    jax.block_until_ready(loss)

    ref = _reconstruction_loss_ref(y_pred, y_true)
    jax.block_until_ready(ref)
    assert jnp.allclose(loss, ref, atol=1e-3, rtol=1e-3), (loss, ref)

    print("KERNEL_OK")
</pallas_src>

<mosaic_0001>
module attributes {stable_mosaic.version = 11 : i64} {
  func.func @kernel(%arg0: i32, %arg1: memref<2xf32, #tpu.memory_space<smem>>, %arg2: memref<256x36xf32, #tpu.memory_space<vmem>>, %arg3: memref<8x256xf32, #tpu.memory_space<vmem>>, %arg4: memref<8x256xf32, #tpu.memory_space<vmem>>, %arg5: memref<1x8x128xf32, #tpu.memory_space<vmem>>) attributes {dimension_semantics = [#tpu.dimension_semantics<parallel>], iteration_bounds = array<i64: 1>, scalar_prefetch = 0 : i64, scratch_operands = 0 : i64, tpu.core_type = #tpu.core_type<tc>, window_params = [{transform_indices = @transform_0, window_bounds = array<i64: 2>}, {pipeline_mode = #tpu.pipeline_mode<synchronous>, transform_indices = @transform_1, window_bounds = array<i64: 256, 36>}, {transform_indices = @transform_2, window_bounds = array<i64: 8, 256>}, {transform_indices = @transform_3, window_bounds = array<i64: 8, 256>}, {transform_indices = @transform_4, window_bounds = array<i64: 1, 8, 128>}]} {
    %c0 = arith.constant 0 : index
    %0 = memref.load %arg1[%c0] : memref<2xf32, #tpu.memory_space<smem>>
    %c1 = arith.constant 1 : index
    %1 = memref.load %arg1[%c1] : memref<2xf32, #tpu.memory_space<smem>>
    %c0_0 = arith.constant 0 : index
    %c0_1 = arith.constant 0 : index
    %2 = vector.load %arg3[%c0_0, %c0_1] : memref<8x256xf32, #tpu.memory_space<vmem>>, vector<8x256xf32>
    %c0_2 = arith.constant 0 : index
    %c0_3 = arith.constant 0 : index
    %3 = vector.load %arg4[%c0_2, %c0_3] : memref<8x256xf32, #tpu.memory_space<vmem>>, vector<8x256xf32>
    %4 = arith.mulf %2, %2 : vector<8x256xf32>
    %5 = arith.mulf %3, %3 : vector<8x256xf32>
    %6 = arith.mulf %2, %3 : vector<8x256xf32>
    %7 = tpu.concatenate %2, %3, %4, %5, %6 in 0 : vector<8x256xf32>, vector<8x256xf32>, vector<8x256xf32>, vector<8x256xf32>, vector<8x256xf32> -> vector<40x256xf32>
    %c0_4 = arith.constant 0 : index
    %c0_5 = arith.constant 0 : index
    %8 = vector.load %arg2[%c0_4, %c0_5] : memref<256x36xf32, #tpu.memory_space<vmem>>, vector<256x36xf32>
    %cst = arith.constant dense<0.000000e+00> : vector<40x36xf32>
    %9 = tpu.matmul %7, %8, %cst {dimension_numbers = #tpu.dot_dimension_numbers<[1], [0], [0], [1], [0, 0, 1, 1], [], []>} : vector<40x256xf32>, vector<256x36xf32>, vector<40x36xf32> -> vector<40x36xf32>
    %10 = vector.extract_strided_slice %9 {offsets = [0, 0], sizes = [8, 36], strides = [1, 1]} : vector<40x36xf32> to vector<8x36xf32>
    %11 = vector.extract_strided_slice %9 {offsets = [8, 0], sizes = [8, 36], strides = [1, 1]} : vector<40x36xf32> to vector<8x36xf32>
    %12 = vector.extract_strided_slice %9 {offsets = [16, 0], sizes = [8, 36], strides = [1, 1]} : vector<40x36xf32> to vector<8x36xf32>
    %13 = vector.extract_strided_slice %9 {offsets = [24, 0], sizes = [8, 36], strides = [1, 1]} : vector<40x36xf32> to vector<8x36xf32>
    %14 = vector.extract_strided_slice %9 {offsets = [32, 0], sizes = [8, 36], strides = [1, 1]} : vector<40x36xf32> to vector<8x36xf32>
    %15 = arith.mulf %10, %10 : vector<8x36xf32>
    %16 = arith.mulf %11, %11 : vector<8x36xf32>
    %17 = arith.mulf %10, %11 : vector<8x36xf32>
    %18 = arith.subf %12, %15 : vector<8x36xf32>
    %19 = arith.subf %13, %16 : vector<8x36xf32>
    %20 = arith.subf %14, %17 : vector<8x36xf32>
    %cst_6 = arith.constant 2.000000e+00 : f32
    %21 = vector.broadcast %cst_6 : f32 to vector<8x36xf32>
    %22 = arith.mulf %21, %17 : vector<8x36xf32>
    %23 = vector.broadcast %0 : f32 to vector<8x36xf32>
    %24 = arith.addf %22, %23 : vector<8x36xf32>
    %cst_7 = arith.constant 2.000000e+00 : f32
    %25 = vector.broadcast %cst_7 : f32 to vector<8x36xf32>
    %26 = arith.mulf %25, %20 : vector<8x36xf32>
    %27 = vector.broadcast %1 : f32 to vector<8x36xf32>
    %28 = arith.addf %26, %27 : vector<8x36xf32>
    %29 = arith.mulf %24, %28 : vector<8x36xf32>
    %30 = arith.addf %15, %16 : vector<8x36xf32>
    %31 = vector.broadcast %0 : f32 to vector<8x36xf32>
    %32 = arith.addf %30, %31 : vector<8x36xf32>
    %33 = arith.addf %18, %19 : vector<8x36xf32>
    %34 = vector.broadcast %1 : f32 to vector<8x36xf32>
    %35 = arith.addf %33, %34 : vector<8x36xf32>
    %36 = arith.mulf %32, %35 : vector<8x36xf32>
    %37 = tpu.reciprocal %36 {approx = true} : vector<8x36xf32> -> vector<8x36xf32>
    %38 = arith.mulf %29, %37 : vector<8x36xf32>
    %39 = vector.shape_cast %38 : vector<8x36xf32> to vector<1x8x36xf32>
    %cst_8 = arith.constant dense<0.000000e+00> : vector<1xf32>
    %40 = vector.multi_reduction <add>, %39, %cst_8 [1, 2] : vector<1x8x36xf32> to vector<1xf32>
    %41 = vector.shape_cast %40 : vector<1xf32> to vector<1x1x1xf32>
    %42 = vector.extract %41[0, 0, 0] : f32 from vector<1x1x1xf32>
    %43 = tpu.iota {dimensions = array<i32: 1>} : vector<1x8x128xi32>
    %44 = tpu.iota {dimensions = array<i32: 2>} : vector<1x8x128xi32>
    %c0_i32 = arith.constant 0 : i32
    %45 = vector.broadcast %c0_i32 : i32 to vector<1x8x128xi32>
    %46 = arith.cmpi eq, %43, %45 : vector<1x8x128xi32>
    %c0_i32_9 = arith.constant 0 : i32
    %47 = vector.broadcast %c0_i32_9 : i32 to vector<1x8x128xi32>
    %48 = arith.cmpi eq, %44, %47 : vector<1x8x128xi32>
    %49 = arith.andi %46, %48 : vector<1x8x128xi1>
    %cst_10 = arith.constant 0.000000e+00 : f32
    %50 = vector.broadcast %42 : f32 to vector<1x8x128xf32>
    %51 = vector.broadcast %cst_10 : f32 to vector<1x8x128xf32>
    %52 = arith.select %49, %50, %51 : vector<1x8x128xi1>, vector<1x8x128xf32>
    %c0_11 = arith.constant 0 : index
    %c0_12 = arith.constant 0 : index
    %c0_13 = arith.constant 0 : index
    %53 = vector.load %arg5[%c0_11, %c0_12, %c0_13] : memref<1x8x128xf32, #tpu.memory_space<vmem>>, vector<1x8x128xf32>
    tpu.vector_store %arg5[%c0_11, %c0_12, %c0_13], %52 {strides = array<i32>} : memref<1x8x128xf32, #tpu.memory_space<vmem>>, vector<1x8x128xf32>,
    return
  }
  func.func @transform_0(%arg0: i32) -> i32 {
    %c0_i32 = arith.constant 0 : i32
    %c0_i32_0 = arith.constant 0 : i32
    return %c0_i32 : i32
  }
  func.func @transform_1(%arg0: i32) -> (i32, i32) {
    %c0_i32 = arith.constant 0 : i32
    %c0_i32_0 = arith.constant 0 : i32
    %c0_i32_1 = arith.constant 0 : i32
    return %c0_i32, %c0_i32_0 : i32, i32
  }
  func.func @transform_2(%arg0: i32) -> (i32, i32) {
    %c0_i32 = arith.constant 0 : i32
    %c0_i32_0 = arith.constant 0 : i32
    return %arg0, %c0_i32 : i32, i32
  }
  func.func @transform_3(%arg0: i32) -> (i32, i32) {
    %c0_i32 = arith.constant 0 : i32
    %c0_i32_0 = arith.constant 0 : i32
    return %arg0, %c0_i32 : i32, i32
  }
  func.func @transform_4(%arg0: i32) -> (i32, i32, i32) {
    %c0_i32 = arith.constant 0 : i32
    %c0_i32_0 = arith.constant 0 : i32
    %c0_i32_1 = arith.constant 0 : i32
    return %arg0, %c0_i32, %c0_i32_0 : i32, i32, i32
  }
}

</mosaic_0001>

<bundles_post_ra>
// kernel: reconstruction_loss.1
= control target key start
LH: loop header
LB: loop body
LE: loop exit
PB: predicated region body
PF: predicated region fallthrough
CT: control target
= control target key end

     0   :  { %9 = vsyncpa [#allocation3], 0  ;;  %s465_s0 = inlined_call_operand.vmem [shape: f32[2], index: 0, kind: input, shape index: {}]   ;;  %s466_s1 = inlined_call_operand.vmem [shape: f32[256,36], index: 1, kind: input, shape index: {}]   ;;  %s467_s2 = inlined_call_operand.vmem [shape: f32[8,256], index: 2, kind: input, shape index: {}]   ;;  %s468_s3 = inlined_call_operand.vmem [shape: f32[8,256], index: 3, kind: input, shape index: {}]   ;;  %s469_s4 = inlined_call_operand.vmem [shape: f32[1,8,128], index: 4, kind: output, shape index: {}]  }
   0x1   :  { %s16_s17 = sshll.u32 %s465_s0, 4  ;;  %s17_s17 = int_to_ptr.vmem [resolvable:$true] %s16_s17 }
   0x2   :  { %s311_s18 = scalar_lea.vmem %s17_s17, 16  ;;  %p316_p1 = scmp.lt.s32.totalorder %s17_s17, %s17_s17 }
   0x3   :  { %p312_p0 = scmp.ne.s32.totalorder %s17_s17, %s311_s18  ;;  %p317_p2 = scmp.lt.s32.totalorder %s311_s18, %s311_s18 }
   0x5   :  { %p318_p3 = por %p317_p2, %p316_p1 }
   0x7   :  { %p319_p4 = pnand %p318_p3, %p312_p0 }
   0x9   :  { %322 = shalt.err (!%p319_p4)
}
   0xa   :  { %s325_s19 = smov [#allocation2]  }
   0xb   :  { %19 = dma.vmem_to_smem %s17_s17, 16, %s325_s19, [#allocation3]  }
   0xc   :  { %323 = dma.done.wait [#allocation3], 16  }
   0xd   :  { %324 = vsyncadd [#allocation3], 4294967280 }
   0xe   :  { %29 = sfence }
   0xf   :  { %v58_v0 = vld [vmem:[%s466_s1 + $0x80] sm:$0xff]  ;;  %v59_v1 = vld [vmem:[%s466_s1 + $0x88] sm:$0xff]  ;;  %v60_v5 = vld [vmem:[%s466_s1 + $0x90] sm:$0xff]  ;;  %vm184_vm0 = vcmask 293888  }
  0x10   :  { %v42_v2 = vld [vmem:[%s466_s1] sm:$0xff]  ;;  %v258_v3 = vpack.c.bf16 %v59_v1, %v58_v0  ;;  %v43_v4 = vld [vmem:[%s466_s1 + $0x8] sm:$0xff]  ;;  %v61_v6 = vld [vmem:[%s466_s1 + $0x98] sm:$0xff] }
  0x11   :  { %v260_v7 = vpack.c.bf16 %v43_v4, %v42_v2  ;;  %v262_v8 = vpack.c.bf16 %v61_v6, %v60_v5  ;;  %v44_v9 = vld [vmem:[%s466_s1 + $0x10] sm:$0xff]  ;;  %v45_v10 = vld [vmem:[%s466_s1 + $0x18] sm:$0xff]  ;;  %v62_v11 = vld [vmem:[%s466_s1 + $0xa0] sm:$0xff] }
  0x12   :  { %259 = vmatprep.subr.bf16.mxu0 %v258_v3  ;;  %290 = vmatprep.subr.bf16.mxu1 %v258_v3  ;;  %v63_v12 = vld [vmem:[%s466_s1 + $0xa8] sm:$0xff]  ;;  %v264_v13 = vpack.c.bf16 %v45_v10, %v44_v9  ;;  %v46_v15 = vld [vmem:[%s466_s1 + $0x20] sm:$0xff]  ;;  %v64_v17 = vld [vmem:[%s466_s1 + $0xb0] sm:$0xff] }
  0x13   :  { %261 = vmatpush3.bf16.msra.mxu0 %v260_v7  ;;  %298 = vmatpush3.bf16.msra.mxu1 %v260_v7  ;;  %v266_v14 = vpack.c.bf16 %v63_v12, %v62_v11  ;;  %v47_v16 = vld [vmem:[%s466_s1 + $0x28] sm:$0xff]  ;;  %v65_v18 = vld [vmem:[%s466_s1 + $0xb8] sm:$0xff]  ;;  %v48_v21 = vld [vmem:[%s466_s1 + $0x30] sm:$0xff] }
  0x14   :  { %263 = vmatprep.subr.bf16.mxu0 %v262_v8  ;;  %291 = vmatprep.subr.bf16.mxu1 %v262_v8  ;;  %v268_v19 = vpack.c.bf16 %v47_v16, %v46_v15  ;;  %v270_v20 = vpack.c.bf16 %v65_v18, %v64_v17  ;;  %v49_v22 = vld [vmem:[%s466_s1 + $0x38] sm:$0xff]  ;;  %v66_v23 = vld [vmem:[%s466_s1 + $0xc0] sm:$0xff]  ;;  %v67_v24 = vld [vmem:[%s466_s1 + $0xc8] sm:$0xff] }
  0x15   :  { %v33_v25 = vld [vmem:[%s467_s2 + $0x8] sm:$0xff]  ;;  %v272_v27 = vpack.c.bf16 %v49_v22, %v48_v21  ;;  %v274_v29 = vpack.c.bf16 %v67_v24, %v66_v23  ;;  %v50_v30 = vld [vmem:[%s466_s1 + $0x40] sm:$0xff]  ;;  %v68_v32 = vld [vmem:[%s466_s1 + $0xd0] sm:$0xff] }
  0x16   :  { %138 = vmatprep.mubr.f32.mxu0 %v33_v25  ;;  %v35_v26 = vld [vmem:[%s468_s3 + $0x8] sm:$0xff]  ;;  %v69_v33 = vld [vmem:[%s466_s1 + $0xd8] sm:$0xff]  ;;  %v52_v36 = vld [vmem:[%s466_s1 + $0x50] sm:$0xff]  ;;  %v37_v56 = vmul.f32 %v33_v25, %v33_v25 }
  0x17   :  { %265 = vmatpush3.bf16.msra.mxu0 %v264_v13  ;;  %299 = vmatpush3.bf16.msra.mxu1 %v264_v13  ;;  %v39_v28 = vmul.f32 %v35_v26, %v35_v26  ;;  %v51_v31 = vld [vmem:[%s466_s1 + $0x48] sm:$0xff]  ;;  %v278_v35 = vpack.c.bf16 %v69_v33, %v68_v32  ;;  %v53_v37 = vld [vmem:[%s466_s1 + $0x58] sm:$0xff]  ;;  %v70_v38 = vld [vmem:[%s466_s1 + $0xe0] sm:$0xff]  ;;  %v41_v54 = vmul.f32 %v35_v26, %v33_v25 }
  0x18   :  { %267 = vmatprep.subr.bf16.mxu0 %v266_v14  ;;  %292 = vmatprep.subr.bf16.mxu1 %v266_v14  ;;  %v276_v34 = vpack.c.bf16 %v51_v31, %v50_v30  ;;  %v71_v39 = vld [vmem:[%s466_s1 + $0xe8] sm:$0xff]  ;;  %v280_v40 = vpack.c.bf16 %v53_v37, %v52_v36  ;;  %v54_v42 = vld [vmem:[%s466_s1 + $0x60] sm:$0xff]  ;;  %v72_v44 = vld [vmem:[%s466_s1 + $0xf0] sm:$0xff]  ;;  %v195_v37 = vlaneseq }
  0x19   :  { %153 = vmatprep.mubr.f32.mxu1 %v39_v28  ;;  %v282_v41 = vpack.c.bf16 %v71_v39, %v70_v38  ;;  %v55_v43 = vld [vmem:[%s466_s1 + $0x68] sm:$0xff]  ;;  %v73_v45 = vld [vmem:[%s466_s1 + $0xf8] sm:$0xff]  ;;  %v56_v48 = vld [vmem:[%s466_s1 + $0x70] sm:$0xff] }
  0x1a   :  { %v284_v46 = vpack.c.bf16 %v55_v43, %v54_v42  ;;  %v286_v47 = vpack.c.bf16 %v73_v45, %v72_v44  ;;  %v57_v49 = vld [vmem:[%s466_s1 + $0x78] sm:$0xff]  ;;  %v34_v51 = vld [vmem:[%s468_s3] sm:$0xff]  ;;  %s30_s1 = sld [smem:[#allocation2]]  ;;  %v196_v38 = vshrl.u32 %v195_v37, 7  ;;  %v198_v39 = vand.u32 127, %v195_v37 }
  0x1b   :  { %269 = vmatpush3.bf16.msra.mxu0 %v268_v19  ;;  %300 = vmatpush3.bf16.msra.mxu1 %v268_v19  ;;  %v288_v50 = vpack.c.bf16 %v57_v49, %v56_v48  ;;  %v38_v52 = vmul.f32 %v34_v51, %v34_v51  ;;  %v32_v53 = vld [vmem:[%s467_s2] sm:$0xff]  ;;  %s210_s2 = sld [smem:[#allocation2 + $0x1]] }
  0x1c   :  { %271 = vmatprep.subr.bf16.mxu0 %v270_v20  ;;  %293 = vmatprep.subr.bf16.mxu1 %v270_v20  ;;  %v40_v55 = vmul.f32 %v34_v51, %v32_v53  ;;  %v36_v57 = vmul.f32 %v32_v53, %v32_v53  ;;  %vm199_vm1 = vcmp.eq.s32.totalorder %v196_v38, 0  ;;  %vm200_vm2 = vcmp.eq.s32.totalorder %v198_v39, 0 }
  0x1d   :  { %vm201_vm3 = vmand %vm199_vm1, %vm200_vm2 }
  0x1f   :  { %273 = vmatpush3.bf16.msra.mxu0 %v272_v27  ;;  %301 = vmatpush3.bf16.msra.mxu1 %v272_v27 }
  0x20   :  { %275 = vmatprep.subr.bf16.mxu0 %v274_v29  ;;  %294 = vmatprep.subr.bf16.mxu1 %v274_v29  ;;  %v171_v15 = vstv %s30_s1 }
  0x21   :  { %v174_v16 = vstv %s210_s2 }
  0x23   :  { %277 = vmatpush3.bf16.msra.mxu0 %v276_v34  ;;  %302 = vmatpush3.bf16.msra.mxu1 %v276_v34 }
  0x24   :  { %279 = vmatprep.subr.bf16.mxu0 %v278_v35  ;;  %295 = vmatprep.subr.bf16.mxu1 %v278_v35 }
  0x27   :  { %281 = vmatpush3.bf16.msra.mxu0 %v280_v40  ;;  %303 = vmatpush3.bf16.msra.mxu1 %v280_v40 }
  0x28   :  { %283 = vmatprep.subr.bf16.mxu0 %v282_v41  ;;  %296 = vmatprep.subr.bf16.mxu1 %v282_v41 }
  0x2b   :  { %285 = vmatpush3.bf16.msra.mxu0 %v284_v46  ;;  %304 = vmatpush3.bf16.msra.mxu1 %v284_v46 }
  0x2c   :  { %287 = vmatprep.subr.bf16.mxu0 %v286_v47  ;;  %297 = vmatprep.subr.bf16.mxu1 %v286_v47 }
  0x2f   :  { %289 = vmatpush3.bf16.msra.mxu0 %v288_v50  ;;  %305 = vmatpush3.bf16.msra.mxu1 %v288_v50 }
  0x32   :  { %139 = vmatmul.mubr.f32.vlgmr.msra.gmra.mrb[0].mxu0 %v32_v53  ;;  %154 = vmatmul.mubr.f32.vlgmr.msra.gmra.mrb[0].mxu1 %v38_v52 }
  0x33   :  { %143 = vmatprep.mubr.f32.mxu0 %v35_v26  ;;  %158 = vmatprep.mubr.f32.mxu1 %v41_v54 }
  0x36   :  { %144 = vmatmul.mubr.f32.gmra.mrb[2].mxu0 %v34_v51  ;;  %159 = vmatmul.mubr.f32.gmra.mrb[2].mxu1 %v40_v55 }
  0x37   :  { %148 = vmatprep.mubr.f32.mxu0 %v37_v56 }
  0x3a   :  { %149 = vmatmul.mubr.f32.gmra.mrb[4].mxu0 %v36_v57 }
 0x105   :  { %v243_v58 = vpop.f32.mrb[0].mxu0  ;;  %v252_v59 = vpop.f32.mrb[0].mxu1 }
 0x106   :  { %v244_v60 = vpop.f32.mrb[1].mxu0  ;;  %v253_v61 = vpop.f32.mrb[1].mxu1 }
 0x107   :  { %v245_v62 = vadd.f32 %v244_v60, %v243_v58  ;;  %v254_v63 = vadd.f32 %v253_v61, %v252_v59 }
 0x109   :  { %v246_v0 = vpop.f32.mrb[2].mxu0  ;;  %v255_v1 = vpop.f32.mrb[2].mxu1  ;;  %v164_v6 = vmul.f32 %v245_v62, %v245_v62 }
 0x10a   :  { %v247_v2 = vpop.f32.mrb[3].mxu0  ;;  %v256_v3 = vpop.f32.mrb[3].mxu1 }
 0x10b   :  { %v248_v4 = vadd.f32 %v247_v2, %v246_v0  ;;  %v257_v5 = vadd.f32 %v256_v3, %v255_v1 }
 0x10d   :  { %v165_v7 = vmul.f32 %v248_v4, %v248_v4  ;;  %v166_v8 = vmul.f32 %v248_v4, %v245_v62  ;;  %v249_v9 = vpop.f32.mrb[4].mxu0 }
 0x10e   :  { %v250_v10 = vpop.f32.mrb[5].mxu0 }
 0x10f   :  { %v170_v11 = vmul.f32 2.0, %v166_v8  ;;  %v177_v12 = vadd.f32 %v165_v7, %v164_v6  ;;  %v168_v13 = vsub.f32 %v254_v63, %v165_v7  ;;  %v169_v14 = vsub.f32 %v257_v5, %v166_v8 }
 0x110   :  { %v251_v17 = vadd.f32 %v250_v10, %v249_v9 }
 0x111   :  { %v173_v18 = vmul.f32 2.0, %v169_v14  ;;  %v172_v21 = vadd.f32 %v171_v15, %v170_v11  ;;  %v178_v24 = vadd.f32 %v177_v12, %v171_v15 }
 0x112   :  { %v167_v19 = vsub.f32 %v251_v17, %v164_v6 }
 0x113   :  { %v175_v20 = vadd.f32 %v174_v16, %v173_v18 }
 0x114   :  { %v179_v22 = vadd.f32 %v168_v13, %v167_v19 }
 0x115   :  { %v176_v23 = vmul.f32 %v175_v20, %v172_v21 }
 0x116   :  { %v180_v25 = vadd.f32 %v179_v22, %v174_v16 }
 0x118   :  { %v181_v26 = vmul.f32 %v180_v25, %v178_v24 }
 0x11a   :  { %309 = vrcp.f32 %v181_v26 }
 0x124   :  { %v310_v27 = vpop.eup %309 }
 0x125   :  { %v183_v28 = vmul.f32 %v310_v27, %v176_v23 }
 0x127   :  { %v185_v29 = vsel %vm184_vm0, %v183_v28, 0.0 }
 0x128   :  { %186 = vadd.xlane.f32.xlu0 %v185_v29 }
 0x1b5   :  { %v187_v30 = vpop.xlane.xlu0 %186 }
 0x1b6   :  { %v188_v31 = vrot.slane %v187_v30, 4 }
 0x1b8   :  { %v189_v32 = vadd.f32 %v188_v31, %v187_v30 }
 0x1ba   :  { %v190_v33 = vrot.slane %v189_v32, 2 }
 0x1bc   :  { %v191_v34 = vadd.f32 %v190_v33, %v189_v32 }
 0x1be   :  { %v192_v35 = vrot.slane %v191_v34, 1 }
 0x1c0   :  { %v193_v36 = vadd.f32 %v192_v35, %v191_v34 }
 0x1c2   :  { %306 = vpush %v193_v36 }
 0x1f3   :  { %s307_s3 = spop %306 }
 0x1f4   :  { %v202_v40 = vstv %s307_s3 }
 0x1f5   :  { %v203_v41 = vsel %vm201_vm3, %v202_v40, 0.0 }
 0x1f6   :  { %204 = vst [vmem:[%s469_s4] sm:$0xff] %v203_v41 }
 0x1f7   :  { %209 = vsyncpa [#allocation3], 1 }

</bundles_post_ra>
